<compile_context>
chip_gen: v7x
topology: tpu7x:2x2x1
jax: 0.10.0
libtpu: 0.0.40
codegen_flags: <defaults>
</compile_context>

<pallas_src>
import jax
import jax.numpy as jnp
from jax.experimental import pallas as pl
from jax.experimental.pallas import tpu as pltpu


ENCODER_OUT_CHANNELS = (8, 16, 32)   # encoder.out_channels
CLASSES1 = 18                        # classes1 in the PyTorch module
TN_MAX = 16384                       # max spatial (lane) elements per grid step


# ---------------------------------------------------------------------------
# Kernel: one folded 1x1 conv over a lane-dense spatial tile.
# ---------------------------------------------------------------------------

def _head_kernel(x_ref, w_ref, b_ref, o_ref):
    # x_ref: (Bk, Cin, TN)  — spatial pixels on lanes, batch sub-block leading.
    # w_ref: (Cout, Cin)    — folded enc->dec->head weight, VMEM-resident.
    # b_ref: (Cout, 1)      — folded bias, kept in f32 for the epilogue.
    # o_ref: (Bk, Cout, TN)
    w = w_ref[...]
    b = b_ref[...]
    for bk in range(x_ref.shape[0]):                  # tiny static unroll over Bk
        acc = jnp.dot(w, x_ref[bk], preferred_element_type=jnp.float32)
        o_ref[bk] = (acc + b).astype(o_ref.dtype)


# ---------------------------------------------------------------------------
# Wrapper: tiling selection + pallas_call.
# ---------------------------------------------------------------------------

def _round_up(n, m):
    return ((n + m - 1) // m) * m


def _pick_tiling(B, HW, tn_max):
    """Pick (Bk, TN, HWp): TN multiple of 128 dividing HWp; Bk packs small images."""
    HWp = _round_up(HW, 128)
    units = HWp // 128
    cap = max(1, tn_max // 128)
    tn_units = 1
    for cand in range(min(units, cap), 0, -1):        # largest divisor of HWp/128
        if units % cand == 0:
            tn_units = cand
            break
    TN = tn_units * 128
    Bk = 1
    if TN == HWp:                                     # whole image fits one tile:
        budget = max(1, tn_max // HWp)                # pack several images per step
        for cand in range(min(B, budget), 0, -1):
            if B % cand == 0:
                Bk = cand
                break
    return Bk, TN, HWp


def samrs_head_fused(x, w_fold, b_fold):
    """Folded enc->dec->head.  x: (B, Cin, H, W) NCHW -> (B, classes1, H, W)."""
    B, Cin, H, W = x.shape
    Cout = w_fold.shape[0]
    HW = H * W
    Bk, TN, HWp = _pick_tiling(B, HW, TN_MAX)

    # NCHW is channel-major: flatten spatial dims, no transposes needed.
    x3 = x.reshape(B, Cin, HW)
    if HWp != HW:
        # TODO(synk): replace with in-kernel masked stores on the ragged tail to
        # avoid this extra HBM pass when H*W is not a multiple of 128.
        x3 = jnp.pad(x3, ((0, 0), (0, 0), (0, HWp - HW)))

    grid = (B // Bk, HWp // TN)

    itemsize = jnp.dtype(x.dtype).itemsize
    cost = pl.CostEstimate(
        flops=2 * B * HW * Cout * Cin,
        transcendentals=0,
        bytes_accessed=(B * HW * (Cin + Cout) * itemsize
                        + Cout * Cin * itemsize + Cout * 4),
    )

    out = pl.pallas_call(
        _head_kernel,
        out_shape=jax.ShapeDtypeStruct((B, Cout, HWp), x.dtype),
        grid_spec=pltpu.PrefetchScalarGridSpec(
            num_scalar_prefetch=0,
            grid=grid,
            in_specs=[
                # activation tile: (Bk, Cin, TN), spatial on lanes (lane-dense)
                pl.BlockSpec((Bk, Cin, TN), lambda i, j: (i, 0, j)),
                # folded weight & bias: constant index_map -> VMEM-resident
                pl.BlockSpec(w_fold.shape, lambda i, j: (0, 0)),
                pl.BlockSpec(b_fold.shape, lambda i, j: (0, 0)),
            ],
            out_specs=pl.BlockSpec((Bk, Cout, TN), lambda i, j: (i, 0, j)),
        ),
        compiler_params=pltpu.CompilerParams(
            dimension_semantics=("parallel", "parallel")),
        cost_estimate=cost,
    )(x3, w_fold, b_fold)

    if HWp != HW:
        out = out[..., :HW]
    return out.reshape(B, Cout, H, W)


# ---------------------------------------------------------------------------
# Parameters (same structure/semantics as before).
# ---------------------------------------------------------------------------

def _uniform(key, shape, bound):
    return jax.random.uniform(key, shape, jnp.float32, -bound, bound)


def init_params(key, in_channels):
    ks = jax.random.split(key, 10)
    p = {}

    # encoder stand-in: three 1x1 projections to the multi-scale channel widths
    for i, c in enumerate(ENCODER_OUT_CHANNELS):
        bnd = 1.0 / float(jnp.sqrt(in_channels))
        p[f"enc_w{i}"] = _uniform(ks[2 * i], (c, in_channels), bnd)
        p[f"enc_b{i}"] = _uniform(ks[2 * i + 1], (c,), bnd)

    # decoder stand-in: concat(features) -> encoder.out_channels[2] channels
    cin_dec = sum(ENCODER_OUT_CHANNELS)
    bnd = 1.0 / float(jnp.sqrt(cin_dec))
    p["dec_w"] = _uniform(ks[6], (ENCODER_OUT_CHANNELS[2], cin_dec), bnd)
    p["dec_b"] = _uniform(ks[7], (ENCODER_OUT_CHANNELS[2],), bnd)

    # semseghead_1: Conv2d(encoder.out_channels[2], classes1, kernel_size=1)
    bnd = 1.0 / float(jnp.sqrt(ENCODER_OUT_CHANNELS[2]))
    p["head_w"] = _uniform(ks[8], (CLASSES1, ENCODER_OUT_CHANNELS[2]), bnd)
    p["head_b"] = _uniform(ks[9], (CLASSES1,), bnd)
    return p


@jax.jit
def samrs_forward(params, x):
    n_enc = len(ENCODER_OUT_CHANNELS)
    wenc = jnp.concatenate([params[f"enc_w{i}"] for i in range(n_enc)], axis=0)
    benc = jnp.concatenate([params[f"enc_b{i}"] for i in range(n_enc)], axis=0)
    wdec, bdec = params["dec_w"], params["dec_b"]
    whead, bhead = params["head_w"], params["head_b"]

    # Fold the whole linear chain offline (exact: every stage is linear, and
    # Dropout2d is identity in eval mode).
    w_fold = whead @ (wdec @ wenc)                       # (classes1, Cin)
    b_fold = whead @ (wdec @ benc + bdec) + bhead        # (classes1,)

    w_fold = w_fold.astype(x.dtype)                      # bf16 storage drop-in on v6e/v7x
    b_fold = b_fold.astype(jnp.float32)[:, None]         # f32 epilogue bias (v5e-safe)
    return samrs_head_fused(x, w_fold, b_fold)


# Pure-JAX reference (unfused path) for a correctness check.
def _reference(params, x):
    n_enc = len(ENCODER_OUT_CHANNELS)
    feats = []
    for i in range(n_enc):
        feats.append(jnp.einsum("oc,bchw->bohw", params[f"enc_w{i}"], x)
                     + params[f"enc_b{i}"][None, :, None, None])
    f = jnp.concatenate(feats, axis=1)
    d = jnp.einsum("oc,bchw->bohw", params["dec_w"], f) \
        + params["dec_b"][None, :, None, None]
    h = jnp.einsum("oc,bchw->bohw", params["head_w"], d) \
        + params["head_b"][None, :, None, None]
    return h


if __name__ == "__main__":
    key = jax.random.PRNGKey(0)
    k_param, k_x = jax.random.split(key)

    B, C, H, W = 2, 4, 16, 16
    x = jax.random.normal(k_x, (B, C, H, W), jnp.float32)

    params = init_params(k_param, C)
    out = samrs_forward(params, x)
    out = jax.block_until_ready(out)

    assert out.shape == (B, CLASSES1, H, W), out.shape
    assert bool(jnp.all(jnp.isfinite(out)))

    ref = _reference(params, x)
    assert bool(jnp.allclose(out, ref, rtol=1e-3, atol=1e-3)), \
        float(jnp.max(jnp.abs(out - ref)))

    print("KERNEL_OK")
</pallas_src>

<mosaic_0001>
module attributes {stable_mosaic.version = 11 : i64} {
  func.func @_head_kernel(%arg0: i32, %arg1: i32, %arg2: memref<2x4x256xf32, #tpu.memory_space<vmem>>, %arg3: memref<18x4xf32, #tpu.memory_space<vmem>>, %arg4: memref<18x1xf32, #tpu.memory_space<vmem>>, %arg5: memref<2x18x256xf32, #tpu.memory_space<vmem>>) attributes {dimension_semantics = [#tpu.dimension_semantics<parallel>, #tpu.dimension_semantics<parallel>], iteration_bounds = array<i64: 1, 1>, scalar_prefetch = 0 : i64, scratch_operands = 0 : i64, tpu.core_type = #tpu.core_type<tc>, window_params = [{transform_indices = @transform_0, window_bounds = array<i64: 2, 4, 256>}, {pipeline_mode = #tpu.pipeline_mode<synchronous>, transform_indices = @transform_1, window_bounds = array<i64: 18, 4>}, {pipeline_mode = #tpu.pipeline_mode<synchronous>, transform_indices = @transform_2, window_bounds = array<i64: 18, 1>}, {transform_indices = @transform_3, window_bounds = array<i64: 2, 18, 256>}]} {
    %c0 = arith.constant 0 : index
    %c0_0 = arith.constant 0 : index
    %0 = vector.load %arg3[%c0, %c0_0] : memref<18x4xf32, #tpu.memory_space<vmem>>, vector<18x4xf32>
    %c0_1 = arith.constant 0 : index
    %c0_2 = arith.constant 0 : index
    %1 = vector.load %arg4[%c0_1, %c0_2] : memref<18x1xf32, #tpu.memory_space<vmem>>, vector<18x1xf32>
    %c0_3 = arith.constant 0 : index
    %c0_4 = arith.constant 0 : index
    %c0_5 = arith.constant 0 : index
    %2 = vector.load %arg2[%c0_3, %c0_4, %c0_5] : memref<2x4x256xf32, #tpu.memory_space<vmem>>, vector<1x4x256xf32>
    %3 = vector.shape_cast %2 : vector<1x4x256xf32> to vector<4x256xf32>
    %cst = arith.constant dense<0.000000e+00> : vector<18x256xf32>
    %4 = tpu.matmul %0, %3, %cst {dimension_numbers = #tpu.dot_dimension_numbers<[1], [0], [0], [1], [0, 0, 1, 1], [], []>} : vector<18x4xf32>, vector<4x256xf32>, vector<18x256xf32> -> vector<18x256xf32>
    %5 = vector.broadcast %1 : vector<18x1xf32> to vector<18x256xf32>
    %6 = arith.addf %4, %5 : vector<18x256xf32>
    %c0_6 = arith.constant 0 : index
    %c0_7 = arith.constant 0 : index
    %c0_8 = arith.constant 0 : index
    %7 = vector.load %arg5[%c0_6, %c0_7, %c0_8] : memref<2x18x256xf32, #tpu.memory_space<vmem>>, vector<1x18x256xf32>
    %8 = vector.shape_cast %7 : vector<1x18x256xf32> to vector<18x256xf32>
    %9 = vector.shape_cast %6 : vector<18x256xf32> to vector<1x18x256xf32>
    tpu.vector_store %arg5[%c0_6, %c0_7, %c0_8], %9 {strides = array<i32>} : memref<2x18x256xf32, #tpu.memory_space<vmem>>, vector<1x18x256xf32>,
    %c1 = arith.constant 1 : index
    %c0_9 = arith.constant 0 : index
    %c0_10 = arith.constant 0 : index
    %10 = vector.load %arg2[%c1, %c0_9, %c0_10] : memref<2x4x256xf32, #tpu.memory_space<vmem>>, vector<1x4x256xf32>
    %11 = vector.shape_cast %10 : vector<1x4x256xf32> to vector<4x256xf32>
    %cst_11 = arith.constant dense<0.000000e+00> : vector<18x256xf32>
    %12 = tpu.matmul %0, %11, %cst_11 {dimension_numbers = #tpu.dot_dimension_numbers<[1], [0], [0], [1], [0, 0, 1, 1], [], []>} : vector<18x4xf32>, vector<4x256xf32>, vector<18x256xf32> -> vector<18x256xf32>
    %13 = vector.broadcast %1 : vector<18x1xf32> to vector<18x256xf32>
    %14 = arith.addf %12, %13 : vector<18x256xf32>
    %c1_12 = arith.constant 1 : index
    %c0_13 = arith.constant 0 : index
    %c0_14 = arith.constant 0 : index
    %15 = vector.load %arg5[%c1_12, %c0_13, %c0_14] : memref<2x18x256xf32, #tpu.memory_space<vmem>>, vector<1x18x256xf32>
    %16 = vector.shape_cast %15 : vector<1x18x256xf32> to vector<18x256xf32>
    %17 = vector.shape_cast %14 : vector<18x256xf32> to vector<1x18x256xf32>
    tpu.vector_store %arg5[%c1_12, %c0_13, %c0_14], %17 {strides = array<i32>} : memref<2x18x256xf32, #tpu.memory_space<vmem>>, vector<1x18x256xf32>,
    return
  }
  func.func @transform_0(%arg0: i32, %arg1: i32) -> (i32, i32, i32) {
    %c0_i32 = arith.constant 0 : i32
    %c0_i32_0 = arith.constant 0 : i32
    return %arg0, %c0_i32, %arg1 : i32, i32, i32
  }
  func.func @transform_1(%arg0: i32, %arg1: i32) -> (i32, i32) {
    %c0_i32 = arith.constant 0 : i32
    %c0_i32_0 = arith.constant 0 : i32
    %c0_i32_1 = arith.constant 0 : i32
    return %c0_i32, %c0_i32_0 : i32, i32
  }
  func.func @transform_2(%arg0: i32, %arg1: i32) -> (i32, i32) {
    %c0_i32 = arith.constant 0 : i32
    %c0_i32_0 = arith.constant 0 : i32
    %c0_i32_1 = arith.constant 0 : i32
    return %c0_i32, %c0_i32_0 : i32, i32
  }
  func.func @transform_3(%arg0: i32, %arg1: i32) -> (i32, i32, i32) {
    %c0_i32 = arith.constant 0 : i32
    %c0_i32_0 = arith.constant 0 : i32
    return %arg0, %c0_i32, %arg1 : i32, i32, i32
  }
}

</mosaic_0001>

<bundles_post_ra>
// kernel: samrs_forward.1
= control target key start
LH: loop header
LB: loop body
LE: loop exit
PB: predicated region body
PF: predicated region fallthrough
CT: control target
= control target key end

     0   :  { %vm48_vm0 = vcmask 1043456   ;;  %v267_v2 = vmov 0.0   ;;  %v268_v5 = vmov 0   ;;  %vm38_vm1 = vcmask 31744   ;;  %s359_s0 = inlined_call_operand.vmem [shape: f32[2,4,256], index: 0, kind: input, shape index: {}]   ;;  %s360_s1 = inlined_call_operand.vmem [shape: f32[18,4], index: 1, kind: input, shape index: {}]   ;;  %s361_s2 = inlined_call_operand.vmem [shape: f32[18,1], index: 2, kind: input, shape index: {}]   ;;  %s362_s3 = inlined_call_operand.vmem [shape: f32[2,18,256], index: 3, kind: output, shape index: {}]  }
   0x1   :  { %v20_v0 = vld [vmem:[%s359_s0] sm:$0xff]  ;;  %v249_v1 = vld [vmem:[%s359_s0 + $0x8] sm:$0xff]  ;;  %117 = vmatprep.mubr.f32.mxu0 %v267_v2  ;;  %214 = vmatprep.mubr.f32.mxu1 %v267_v2  ;;  %v19_v9 = vld [vmem:[%s361_s2 + $0x10] sm:$0x3] }
   0x2   :  { %v37_v3 = vcombine.high %v20_v0, %v20_v0  ;;  %v145_v4 = vcombine.high %v249_v1, %v249_v1  ;;  %263 = vset.pattern.permute.xlu0 %v268_v5  ;;  %v17_v6 = vld [vmem:[%s361_s2] sm:$0xff]  ;;  %264 = vset.pattern.permute.xlu1 %v268_v5  ;;  %v18_v8 = vld [vmem:[%s361_s2 + $0x8] sm:$0xff]  ;;  %v16_v11 = vld [vmem:[%s360_s1 + $0x10] sm:$0x3] }
   0x3   :  { %v14_v7 = vld [vmem:[%s360_s1] sm:$0xff]  ;;  %23 = vperm.xlu0 %263, %v17_v6   ;;  %v15_v10 = vld [vmem:[%s360_s1 + $0x8] sm:$0xff]  ;;  %33 = vperm.xlu1 %264, %v19_v9  }
   0x4   :  { %244 = vmatprep.subr.msk.mxu0 %vm48_vm0, %v37_v3  ;;  %250 = vmatprep.subr.msk.mxu1 %vm48_vm0, %v145_v4 }
   0x5   :  { %245 = vmatpush1.msk.msra.mxu0 %vm48_vm0, %v20_v0  ;;  %251 = vmatpush1.msk.msra.mxu1 %vm48_vm0, %v249_v1 }
   0x6   :  { %246 = vmatmul.mubr.msk.f32.vlgmr.msra.gmra.mrb[0].mxu0 %vm38_vm1, %v14_v7  ;;  %252 = vmatmul.mubr.msk.f32.vlgmr.msra.gmra.mrb[0].mxu1 %vm38_vm1, %v14_v7 }
   0x7   :  { %123 = vmatprep.mubr.f32.mxu0 %v267_v2  ;;  %220 = vmatprep.mubr.f32.mxu1 %v267_v2 }
   0x8   :  { %28 = vperm.xlu0 %263, %v18_v8  }
   0xa   :  { %247 = vmatmul.mubr.msk.f32.gmra.mrb[2].mxu0 %vm38_vm1, %v15_v10  ;;  %253 = vmatmul.mubr.msk.f32.gmra.mrb[2].mxu1 %vm38_vm1, %v15_v10 }
   0xb   :  { %129 = vmatprep.mubr.f32.mxu0 %v267_v2  ;;  %226 = vmatprep.mubr.f32.mxu1 %v267_v2 }
   0xe   :  { %248 = vmatmul.mubr.msk.f32.gmra.mrb[4].mxu0 %vm38_vm1, %v16_v11  ;;  %254 = vmatmul.mubr.msk.f32.gmra.mrb[4].mxu1 %vm38_vm1, %v16_v11 }
  0x82   :  { %v24_v12 = vpop.permute.xlu0 %23  ;;  %v34_v30 = vpop.permute.xlu1 %33 }
  0x87   :  { %v29_v21 = vpop.permute.xlu0 %28 }
  0xd9   :  { %v119_v13 = vpop.f32.mrb[0].mxu0  ;;  %v216_v14 = vpop.f32.mrb[0].mxu1 }
  0xda   :  { %v120_v15 = vadd.f32 %v119_v13, %v24_v12  ;;  %v217_v16 = vadd.f32 %v216_v14, %v24_v12  ;;  %v121_v17 = vpop.f32.mrb[1].mxu0  ;;  %v218_v18 = vpop.f32.mrb[1].mxu1 }
  0xdb   :  { %v122_v19 = vadd.f32 %v121_v17, %v24_v12  ;;  %v219_v20 = vadd.f32 %v218_v18, %v24_v12 }
  0xdc   :  { %136 = vst [vmem:[%s362_s3] sm:$0xff] %v120_v15  ;;  %255 = vst [vmem:[%s362_s3 + $0x30] sm:$0xff] %v217_v16 }
  0xdd   :  { %137 = vst [vmem:[%s362_s3 + $0x8] sm:$0xff] %v122_v19  ;;  %256 = vst [vmem:[%s362_s3 + $0x38] sm:$0xff] %v219_v20  ;;  %v125_v22 = vpop.f32.mrb[2].mxu0  ;;  %v222_v23 = vpop.f32.mrb[2].mxu1 }
  0xde   :  { %v126_v24 = vadd.f32 %v125_v22, %v29_v21  ;;  %v223_v25 = vadd.f32 %v222_v23, %v29_v21  ;;  %v127_v26 = vpop.f32.mrb[3].mxu0  ;;  %v224_v27 = vpop.f32.mrb[3].mxu1 }
  0xdf   :  { %v128_v28 = vadd.f32 %v127_v26, %v29_v21  ;;  %v225_v29 = vadd.f32 %v224_v27, %v29_v21 }
  0xe0   :  { %138 = vst [vmem:[%s362_s3 + $0x10] sm:$0xff] %v126_v24  ;;  %257 = vst [vmem:[%s362_s3 + $0x40] sm:$0xff] %v223_v25 }
  0xe1   :  { %139 = vst [vmem:[%s362_s3 + $0x18] sm:$0xff] %v128_v28  ;;  %258 = vst [vmem:[%s362_s3 + $0x48] sm:$0xff] %v225_v29  ;;  %v131_v31 = vpop.f32.mrb[4].mxu0  ;;  %v228_v32 = vpop.f32.mrb[4].mxu1 }
  0xe2   :  { %v132_v33 = vadd.f32 %v131_v31, %v34_v30  ;;  %v229_v34 = vadd.f32 %v228_v32, %v34_v30  ;;  %v133_v35 = vpop.f32.mrb[5].mxu0  ;;  %v230_v36 = vpop.f32.mrb[5].mxu1 }
  0xe3   :  { %v134_v37 = vadd.f32 %v133_v35, %v34_v30  ;;  %v231_v38 = vadd.f32 %v230_v36, %v34_v30 }
  0xe4   :  { %140 = vst [vmem:[%s362_s3 + $0x20] sm:$0x3] %v132_v33  ;;  %259 = vst [vmem:[%s362_s3 + $0x50] sm:$0x3] %v229_v34 }
  0xe5   :  { %141 = vst [vmem:[%s362_s3 + $0x28] sm:$0x3] %v134_v37  ;;  %260 = vst [vmem:[%s362_s3 + $0x58] sm:$0x3] %v231_v38 }

</bundles_post_ra>
